<compile_context>
chip_gen: v7x
topology: tpu7x:2x2x1
jax: 0.10.0
libtpu: 0.0.40
codegen_flags: <defaults>
</compile_context>

<pallas_src>
import jax
import jax.numpy as jnp
from jax import lax
from jax.experimental import pallas as pl
from jax.experimental.pallas import tpu as pltpu


def _round_up(x: int, m: int) -> int:
    return ((x + m - 1) // m) * m


def _embedding_gather_kernel(ids_ref, table_ref, out_ref):
    # ids_ref:   (N_pad,) int32, SMEM (scalar-prefetch, full array)
    # table_ref: (vocab, dim) VMEM (resident; same block every grid step)
    # out_ref:   (TB, dim)   VMEM output tile for this grid step
    tb = out_ref.shape[0]
    base = pl.program_id(0) * tb

    def body(t, carry):
        row = ids_ref[base + t]                                   # SMEM scalar read
        out_ref[pl.ds(t, 1), :] = table_ref[pl.ds(row, 1), :]     # 1-row gather copy
        return carry

    lax.fori_loop(0, tb, body, 0)


def embedding_forward(x, table, *, tokens_per_block=128):
    """x: (B, S) int token indices; table: (vocab, dim) -> (B, S, dim)."""
    B, S = x.shape
    vocab, dim = table.shape
    N = B * S
    itemsize = jnp.dtype(table.dtype).itemsize

    # Clamp ids (no runtime bounds checks on TPU; torch would raise on OOB).
    ids = jnp.clip(x.reshape(N).astype(jnp.int32), 0, vocab - 1)

    # Block size: multiple of 8 sublanes, capped at tokens_per_block.
    TB = min(tokens_per_block, _round_up(N, 8))
    N_pad = _round_up(N, TB)
    if N_pad != N:
        ids = jnp.pad(ids, (0, N_pad - N))   # pad with valid id 0, sliced off below

    table_bytes = vocab * dim * itemsize
    out_block_bytes = TB * dim * itemsize
    vmem_limit = int(2 * table_bytes + 2 * out_block_bytes + (4 << 20))

    out_flat = pl.pallas_call(
        _embedding_gather_kernel,
        out_shape=jax.ShapeDtypeStruct((N_pad, dim), table.dtype),
        grid_spec=pltpu.PrefetchScalarGridSpec(
            num_scalar_prefetch=1,            # ids -> SMEM, passed to index_maps too
            grid=(N_pad // TB,),
            in_specs=[
                # Full embedding table resident in VMEM across all steps.
                # TODO(synk): for realistic (large) vocab, switch to an HBM-resident
                # table (memory_space=pl.ANY) + per-row async-copy gather.
                pl.BlockSpec((vocab, dim), lambda i, ids: (0, 0)),
            ],
            out_specs=pl.BlockSpec((TB, dim), lambda i, ids: (i, 0)),
        ),
        compiler_params=pltpu.CompilerParams(
            dimension_semantics=("parallel",),
            vmem_limit_bytes=vmem_limit,
        ),
        cost_estimate=pl.CostEstimate(
            flops=0,
            transcendentals=0,
            bytes_accessed=N_pad * dim * itemsize + table_bytes + N_pad * 4,
        ),
    )(ids, table)

    return out_flat[:N].reshape(B, S, dim)


if __name__ == "__main__":
    # Small shapes consistent with EmbeddingLayer(vocab_size, dim).
    vocab_size = 128
    dim = 128
    B, S = 2, 128      # 256 tokens -> 2 grid steps of 128 tokens each

    key = jax.random.PRNGKey(0)
    k_w, k_x = jax.random.split(key)

    # nn.Embedding default init: weight ~ N(0, 1)
    table = jax.random.normal(k_w, (vocab_size, dim), dtype=jnp.float32)
    x = jax.random.randint(k_x, (B, S), 0, vocab_size, dtype=jnp.int32)

    out = embedding_forward(x, table)
    out = jax.block_until_ready(out)

    # Sanity check against plain-JAX gather semantics of nn.Embedding.
    ref = table[x]
    assert out.shape == (B, S, dim)
    assert jnp.allclose(out, ref), "mismatch vs reference gather"

    print("KERNEL_OK")
</pallas_src>

<mosaic_0001>
module attributes {stable_mosaic.version = 11 : i64} {
  func.func @_embedding_gather_kernel(%arg0: i32, %arg1: memref<256xi32, #tpu.memory_space<smem>>, %arg2: memref<128x128xf32, #tpu.memory_space<vmem>>, %arg3: memref<128x128xf32, #tpu.memory_space<vmem>>) attributes {dimension_semantics = [#tpu.dimension_semantics<parallel>], iteration_bounds = array<i64: 2>, scalar_prefetch = 1 : i64, scratch_operands = 0 : i64, tpu.core_type = #tpu.core_type<tc>, window_params = [{pipeline_mode = #tpu.pipeline_mode<synchronous>, transform_indices = @transform_0, window_bounds = array<i64: 128, 128>}, {transform_indices = @transform_1, window_bounds = array<i64: 128, 128>}]} {
    %c128_i32 = arith.constant 128 : i32
    %0 = arith.muli %arg0, %c128_i32 : i32
    %c0_i32 = arith.constant 0 : i32
    %c128_i32_0 = arith.constant 128 : i32
    %1 = arith.addi %c0_i32, %c128_i32_0 : i32
    %c1_i32 = arith.constant 1 : i32
    scf.for %arg4 = %c0_i32 to %1 step %c1_i32  : i32 {
      %2 = arith.addi %0, %arg4 : i32
      %3 = arith.index_cast %2 : i32 to index
      %4 = memref.load %arg1[%3] : memref<256xi32, #tpu.memory_space<smem>>
      %5 = arith.index_cast %4 : i32 to index
      %c0 = arith.constant 0 : index
      %6 = vector.load %arg2[%5, %c0] : memref<128x128xf32, #tpu.memory_space<vmem>>, vector<1x128xf32>
      %7 = arith.index_cast %arg4 : i32 to index
      %c0_2 = arith.constant 0 : index
      %8 = vector.load %arg3[%7, %c0_2] : memref<128x128xf32, #tpu.memory_space<vmem>>, vector<1x128xf32>
      tpu.vector_store %arg3[%7, %c0_2], %6 {strides = array<i32>} : memref<128x128xf32, #tpu.memory_space<vmem>>, vector<1x128xf32>,
    }
    %c128_i32_1 = arith.constant 128 : i32
    return
  }
  func.func @transform_0(%arg0: i32, %arg1: memref<256xi32, #tpu.memory_space<smem>>) -> (i32, i32) {
    %c0_i32 = arith.constant 0 : i32
    %c0_i32_0 = arith.constant 0 : i32
    %c0_i32_1 = arith.constant 0 : i32
    return %c0_i32, %c0_i32_0 : i32, i32
  }
  func.func @transform_1(%arg0: i32, %arg1: memref<256xi32, #tpu.memory_space<smem>>) -> (i32, i32) {
    %c0_i32 = arith.constant 0 : i32
    %c0_i32_0 = arith.constant 0 : i32
    return %arg0, %c0_i32 : i32, i32
  }
}

</mosaic_0001>

<bundles_post_ra>
// kernel: tpu_custom_call.1
= control target key start
LH: loop header
LB: loop body
LE: loop exit
PB: predicated region body
PF: predicated region fallthrough
CT: control target
= control target key end

     0   :  { %s572_s0 = inlined_call_operand.hbm [shape: s32[256], index: 0, kind: input, shape index: {}]   ;;  %s573_s1 = inlined_call_operand.hbm [shape: f32[128,128], index: 1, kind: input, shape index: {}]   ;;  %s574_s2 = inlined_call_operand.hbm [shape: f32[256,128], index: 2, kind: output, shape index: {}]  }
   0x1   :  { %s288_s11 = scalar_lea.hbm %s572_s0, 32 }
   0x2   :  { %p289_p0 = scmp.ne.s32.totalorder %s572_s0, %s288_s11  ;;  %p292_p1 = scmp.lt.u32.totalorder %s288_s11, %s572_s0 }
   0x4   :  { %p294_p2 = pnand %p292_p1, %p289_p0 }
   0x6   :  { %297 = shalt.err (!%p294_p2)  }
   0x7   :  { %s404_s16 = smov [#allocation3]  }
   0x8   :  { %8 = dma.hbm_to_smem %s572_s0, 32, %s404_s16, [#allocation2] }
   0x9   :  { %374 = dma.done.wait [#allocation2], 32 }
   0xa   :  { %375 = vsyncadd [#allocation2], 4294967264 }
   0xb   :  { %10 = sfence }
   0xc   :  { %11 = vsyncpa [#allocation5], 0 }
   0xd   :  { %12 = vsyncpa [#allocation6], 0 }
   0xe   :  { %14 = vsyncpa [#allocation6 + $0x1], 0  ;;  %s438_s19 = smov 0   ;;  %s440_s20 = smov 0  }
   0xf   :  { %s442_s21 = smov 0   ;;  %s444_s22 = smov 0  }
  0x10 LB: > { %s459_s0 = sadd.s32 4294967295, %s398_s22   ;;  %s212_s23 = sadd.s32 4294967294, %s398_s22   ;;  %s398_s22 = sphi %s444_s22, %s590_s22   ;;  %s394_s21 = sphi %s442_s21, %s589_s21   ;;  %s390_s20 = sphi %s440_s20, %s588_s20   ;;  %s386_s19 = sphi %s438_s19, %s587_s19  }
  0x11   : > { %s463_s24 = sadd.s32 1, %s398_s22   ;;  %s48_s25 = sadd.s32 1, %s394_s21 }
  0x12   : > { %s45_s26 = ssub.s32 %s398_s22, %s463_s24  ;;  %p58_p3 = scmp.ne.s32.totalorder %s394_s21, %s390_s20 }
  0x13   : > { %p46_p4 = scmp.eq.s32.totalorder %s45_s26, 0  ;;  %p59_p5 = scmp.eq.s32.totalorder %s459_s0, 1 }
  0x14   : > { %p64_p6 = scmp.ne.s32.totalorder %s390_s20, %s386_s19  ;;  %p65_p7 = scmp.eq.s32.totalorder %s212_s23, 1 }
  0x15   : > { %s474_s27 = scalar_select %p46_p4, %s394_s21, %s48_s25  }
  0x16   : > { %p476_p8 = por %p59_p5, %p58_p3  ;;  %p480_p9 = por %p65_p7, %p64_p6 }
  0x17   : > { %p213_p10 = scmp.ge.s32.totalorder %s398_s22, 1  ;;  %p72_p11 = scmp.lt.s32.totalorder %s398_s22, 3 }
  0x18   : > { %s578_s28 = scalar_select %p476_p8, 1, 0 }
  0x19   : > { %s579_s29 = scalar_select %p480_p9, 1, 0 }
  0x1a   : > { %p575_p12 = scmp.eq.s32.totalorder %s459_s0, 0  ;;  %p487_p13 = pnand %p213_p10, %p72_p11 }
  0x1b   : > { %s405_s3 = smov [#allocation4]   ;;  %s298_s8 = scalar_lea.hbm %s573_s1, 2048 }
  0x1c   : > { %s580_s30 = scalar_select %p487_p13, 1, 0 }
  0x1d   : > { %s84_s4 = sshll.u32 %s405_s3, 4  ;;  %p231_p0 = pneg %p487_p13  ;;  %s85_s4 = int_to_ptr.vmem [resolvable:$true] %s84_s4 }
  0x1e   : > { %p299_p2 = scmp.ne.s32.totalorder %s573_s1, %s298_s8  ;;  %p305_p6 = scmp.lt.u32.totalorder %s298_s8, %s573_s1 }
  0x1f   : > { %p495_p1 = pnand %p575_p12, %p231_p0 }
  0x21   : > { %p300_p3 = pneg %p495_p1 }
  0x23   : > { %p301_p4 = pnand %p300_p3, %p299_p2 }
  0x25   : > { %p302_p5 = pneg %p301_p4 }
  0x27   : > { %p307_p7 = pnand %p305_p6, %p302_p5 }
  0x29   : > { %310 = shalt.err (!%p307_p7)
}
  0x2a   : > { %s311_s13 = scalar_lea.vmem %s85_s4, 2048  ;;  %p319_p12 = scmp.lt.s32.totalorder %s85_s4, %s85_s4 }
  0x2b   : > { %p312_p10 = scmp.ne.s32.totalorder %s85_s4, %s311_s13  ;;  %p320_p9 = scmp.lt.s32.totalorder %s311_s13, %s311_s13 }
  0x2d   : > { %p314_p11 = pnand %p312_p10, %p300_p3  ;;  %p321_p8 = por %p320_p9, %p319_p12 }
  0x2f   : > { %p315_p0 = pneg %p314_p11 }
  0x31   : > { %p322_p13 = pnand %p321_p8, %p315_p0 }
  0x33   : > { %325 = shalt.err (!%p322_p13)
}
  0x34   : > { %s406_s14 = smov 128   ;;  %s407_s15 = smov 8  }
  0x35   : > { %234 = dma.hbm_to_vmem [thread:$0]  (!%p495_p1), %s573_s1, 2048, %s85_s4, [#allocation5], %s406_s14, %s406_s14, %s407_s15  }
  0x36   : > { %p582_p2 = scmp.ne.s32.totalorder %s580_s30, 0 }
  0x37   : > { %p583_p4 = scmp.eq.s32.totalorder (!%p582_p2), %s459_s0, 0 }
  0x38   : > { %100 = sbr.rel (%p582_p2) target bundleno = 97 (0x61), region = 24 }
  0x3f   : > { %377 = dma.done.wait (%p583_p4), [#allocation5], 2048   ;;  %p584_p3 = pmov %p583_p4 }
  0x40   : > { %s112_s18 = sand.u32 1, %s390_s20   ;;  %s218_s23 = sshll.u32 %s459_s0, 7 }
  0x41   : > { %379 = vsyncadd (%p584_p3), [#allocation5], 4294965248  ;;  %s217_s25 = sshll.u32 %s112_s18, 7  ;;  %s400_s3 = smov 0  }
  0x42   : > { %s114_s26 = scalar_lea.vmem [#allocation7], %s217_s25 }
  0x43 LB: >> { %s123_s4 = sadd.s32 %s402_s3, %s218_s23  ;;  %s127_s30 = scalar_lea.vmem %s114_s26, %s402_s3 [#allocation7]  ;;  %s402_s3 = sphi %s400_s3, %s122_s3  }
  0x44   : >> { %s124_s5 = sld [smem:[#allocation3 + %s123_s4]]  ;;  %s122_s3 = sadd.s32 1, %s402_s3  }
  0x45   : >> { %p119_p8 = scmp.ge.s32.totalorder %s122_s3, 128  }
  0x46   : > { %s224_s7 = sshll.u32 (%p119_p8), %s459_s0, 11  ;;  %s143_s11 = sshll.u32 (%p119_p8), %s114_s26, 4  ;;  %s529_s11 = int_to_ptr.vmem [resolvable:$true] %s143_s11 }
  0x47   : > { %121 = sbr.rel (!%p119_p8) target bundleno = 67 (0x43), region = 70  ;;  %s527_s10 = scalar_lea.hbm (%p119_p8), %s574_s2, %s224_s7 }
  0x48   : > { %s531_s12 = scalar_lea.sflag (%p119_p8), [#allocation6], %s112_s18  ;;  %s326_s13 = scalar_lea.vmem (%p119_p8), %s529_s11, 2048 }
  0x49   : > { %p327_p9 = scmp.ne.s32.totalorder (%p119_p8), %s529_s11, %s326_s13  ;;  %p585_p12 = scmp.ne.s32.totalorder (%p119_p8), %s578_s28, 0 }
  0x4a   : >> { %s125_s6 = scalar_lea.vmem [#allocation4], %s124_s5  ;;  %s408_s14 = smov (%p119_p8), [#allocation7]  }
  0x4b   : >> { %v126_v0 = vld [vmem:[%s125_s6] sm:$0x1]  ;;  %p328_p13 = pnand (%p119_p8), %p327_p9, %p585_p12  ;;  %s330_s0 = sshll.u32 (%p119_p8), %s408_s14, 4  ;;  %s331_s0 = int_to_ptr.vmem [resolvable:$false] %s330_s0 }
  0x4c   : >> { %128 = vst [vmem:[%s127_s30] sm:$0x1] %v126_v0  ;;  %s332_s15 = scalar_lea.vmem (%p119_p8), %s331_s0, 4096  ;;  %p333_p5 = scmp.lt.s32.totalorder (%p119_p8), %s529_s11, %s331_s0 }
  0x4d   : > { %p329_p1 = pneg (%p119_p8), %p328_p13  ;;  %p334_p6 = scmp.lt.s32.totalorder (%p119_p8), %s332_s15, %s326_s13 }
  0x4f   : > { %p335_p7 = por %p334_p6, %p333_p5 }
  0x51   : > { %p336_p10 = pnand %p335_p7, %p329_p1 }
  0x53   : > { %339 = shalt.err (!%p336_p10)
}
  0x54   : > { %s340_s16 = scalar_lea.hbm %s527_s10, 2048  ;;  %s344_s23 = scalar_lea.hbm %s574_s2, 4096 }
  0x55   : > { %p341_p11 = scmp.ne.s32.totalorder %s527_s10, %s340_s16  ;;  %p345_p4 = scmp.lt.u32.totalorder %s527_s10, %s574_s2 }
  0x56   : > { %p346_p3 = scmp.lt.u32.totalorder %s344_s23, %s340_s16  ;;  %p348_p9 = scmp.lt.u32.totalorder %s340_s16, %s527_s10 }
  0x57   : > { %p342_p0 = pnand %p341_p11, %p585_p12 }
  0x58   : > { %p347_p8 = por %p346_p3, %p345_p4 }
  0x59   : > { %p343_p2 = pneg %p342_p0 }
  0x5a   : > { %p349_p13 = por %p348_p9, %p347_p8 }
  0x5c   : > { %p350_p1 = pnand %p349_p13, %p343_p2 }
  0x5e   : > { %353 = shalt.err (!%p350_p1)
}
  0x5f   : > { %s409_s3 = smov 128   ;;  %s410_s4 = smov 8  }
  0x60   : > { %229 = dma.vmem_to_hbm [thread:$0]  (%p585_p12), %s529_s11, 2048, %s527_s10, %s531_s12, %s409_s3, %s409_s3, %s410_s4  }
  0x61 PF: > { %p241_p5 = scmp.ge.s32.totalorder %s398_s22, 2  ;;  %s158_s5 = sand.u32 1, %s386_s19  }
  0x62   : > { %p586_p6 = scmp.ne.s32.totalorder %s579_s29, 0  ;;  %s159_s30 = scalar_lea.sflag [#allocation6], %s158_s5 }
  0x64   : > { %p236_p7 = pnand %p241_p5, %p586_p6 }
  0x66   : > { %381 = dma.done.wait (!%p236_p7), %s159_s30, 2048  }
  0x67   : > { %383 = vsyncadd (!%p236_p7), %s159_s30, 4294965248  ;;  %p17_p10 = scmp.ge.s32.totalorder %s463_s24, 4   ;;  %s587_s19 = smov %s390_s20 }
  0x68   : > { %s588_s20 = smov %s394_s21  ;;  %s589_s21 = smov %s474_s27 }
  0x69   : > { %s590_s22 = smov %s463_s24  ;;  %19 = sbr.rel (!%p17_p10) target bundleno = 16 (0x10), region = 81 }
  0x70   :  { %164 = vsyncpa [#allocation5], 1 }
  0x71   :  { %166 = vsyncpa [#allocation5 + $0x1], 1 }
  0x72   :  { %167 = vsyncpa [#allocation6], 1 }
  0x73   :  { %169 = vsyncpa [#allocation6 + $0x1], 1 }

</bundles_post_ra>
